<compile_context>
chip_gen: v7x
topology: tpu7x:2x2x1
jax: 0.10.0
libtpu: 0.0.40
codegen_flags: <defaults>
</compile_context>

<pallas_src>
import functools

import jax
import jax.numpy as jnp
from jax import lax
from jax.experimental import pallas as pl
from jax.experimental.pallas import tpu as pltpu


def _round_up(x, m):
    return ((x + m - 1) // m) * m


def _choose_tile(n, d):
    """Pick the pair-matrix tile: big tiles amortize per-step overhead and fill
    the 256-wide MXU (v6e/v7x); padding waste >25% forces a smaller tile."""
    if n <= 256:
        return max(8, _round_up(n, 8))          # single block, one grid step
    candidates = [512, 256, 128] if d <= 256 else [256, 128]
    for t in candidates:
        n_pad = _round_up(n, t)
        if (n_pad - n) / n_pad <= 0.25:
            return t
    return 128


def _pair_block_values(ei, ej, sqi, sqj, li, lj, margin):
    """Per-pair loss values for one (tile, tile) block via the Gram matrix."""
    gram = lax.dot_general(
        ei, ej, (((1,), (1,)), ((), ())), preferred_element_type=jnp.float32,
    )                                                           # [T, T] f32 (MXU)
    d2 = jnp.maximum(sqi + sqj - 2.0 * gram, 0.0)
    neg = jnp.maximum(margin - jnp.sqrt(d2), 0.0)
    return jnp.where(li == lj, d2, neg * neg)                   # pos -> d2, neg -> relu^2


def _accumulate_block(acc_ref, val, bi, bj, *, tile, n_valid, nb, has_pad):
    """Add one block's contribution into the (tile, tile) VMEM accumulator."""
    is_full = bj > bi                            # strictly above-diagonal block
    if has_pad:
        is_full = jnp.logical_and(is_full, bj < nb - 1)   # last block col holds padding

    @pl.when(is_full)
    def _():
        acc_ref[...] += val                      # no mask needed: pure VPU adds

    @pl.when(jnp.logical_not(is_full))
    def _():
        # Mask from [T,1] / [1,T] iota broadcasts (cheap) instead of (T,T) iotas.
        row_g = lax.broadcasted_iota(jnp.int32, (tile, 1), 0) + bi * tile
        col_g = lax.broadcasted_iota(jnp.int32, (1, tile), 1) + bj * tile
        mask = col_g > row_g                     # strict upper triangle
        if has_pad:
            # col < n_valid implies row < n_valid because row < col.
            mask = jnp.logical_and(mask, col_g < n_valid)
        acc_ref[...] += jnp.where(mask, val, 0.0)


def _finalize(out_ref, acc_ref, inv_pairs):
    total = jnp.sum(acc_ref[...]) * inv_pairs    # single cross-lane reduce per core
    out_ref[...] = jnp.zeros(out_ref.shape, jnp.float32) + total


def _kernel_resident(bi_ref, bj_ref, emb_ref, sidec_ref, sider_ref, out_ref, acc_ref,
                     *, margin, tile, n_valid, nb, has_pad, inv_pairs,
                     spc, n_steps, table_padded):
    s = pl.program_id(1)
    g = pl.program_id(0) * spc + s               # global index into the block table

    @pl.when(s == 0)
    def _():
        acc_ref[...] = jnp.zeros_like(acc_ref)

    def _step():
        bi = bi_ref[g]
        bj = bj_ref[g]
        ei = emb_ref[bi]                         # (tile, d) from the resident matrix
        ej = emb_ref[bj]
        sc = sidec_ref[bi]                       # (tile, 2) = [||e||^2, label]
        sr = sider_ref[bj]                       # (2, tile)
        val = _pair_block_values(ei, ej, sc[:, 0:1], sr[0:1, :],
                                 sc[:, 1:2], sr[1:2, :], margin)
        _accumulate_block(acc_ref, val, bi, bj,
                          tile=tile, n_valid=n_valid, nb=nb, has_pad=has_pad)

    if table_padded:
        pl.when(g < n_steps)(_step)              # padded table entries do nothing
    else:
        _step()

    @pl.when(s == spc - 1)
    def _():
        _finalize(out_ref, acc_ref, inv_pairs)


def _kernel_tiled(bi_ref, bj_ref, ei_ref, ej_ref, sidec_ref, sider_ref, out_ref, acc_ref,
                  *, margin, tile, n_valid, nb, has_pad, inv_pairs,
                  spc, n_steps, table_padded):
    s = pl.program_id(1)
    g = pl.program_id(0) * spc + s

    @pl.when(s == 0)
    def _():
        acc_ref[...] = jnp.zeros_like(acc_ref)

    def _step():
        bi = bi_ref[g]
        bj = bj_ref[g]
        sc = sidec_ref[...]                      # (tile, 2)
        sr = sider_ref[...]                      # (2, tile)
        val = _pair_block_values(ei_ref[...], ej_ref[...], sc[:, 0:1], sr[0:1, :],
                                 sc[:, 1:2], sr[1:2, :], margin)
        _accumulate_block(acc_ref, val, bi, bj,
                          tile=tile, n_valid=n_valid, nb=nb, has_pad=has_pad)

    if table_padded:
        pl.when(g < n_steps)(_step)
    else:
        _step()

    @pl.when(s == spc - 1)
    def _():
        _finalize(out_ref, acc_ref, inv_pairs)


def online_contrastive_loss(embeddings, target, margin=1.0, *,
                            downcast_to_bf16=False, vmem_resident=None):
    """All-pairs OnlineContrastiveLoss forward.

    embeddings: [N, D] float array (f32 or bf16), target: [N] integer labels.
    Returns a scalar f32 loss.
    """
    n, d = embeddings.shape
    if n < 2:
        raise ValueError("OnlineContrastiveLoss needs at least 2 embeddings.")

    emb = embeddings                             # native dtype feeds the MXU
    if downcast_to_bf16 and emb.dtype == jnp.float32:
        emb = emb.astype(jnp.bfloat16)

    tile = _choose_tile(n, d)
    nb = -(-n // tile)
    n_pad = nb * tile
    has_pad = n_pad != n
    if nb > 1 and tile % 128 != 0:
        raise ValueError("tile must be a multiple of 128 when the batch is tiled")

    lab = target.astype(jnp.float32)             # labels exact in f32 (< 2^24)
    if has_pad:
        emb = jnp.pad(emb, ((0, n_pad - n), (0, 0)))
        lab = jnp.pad(lab, (0, n_pad - n), constant_values=-1.0)

    sq = jnp.sum(jnp.square(emb.astype(jnp.float32)), axis=1)    # [Npad] f32 row norms
    side_col = jnp.stack([sq, lab], axis=1)                      # (Npad, 2)
    side_row = jnp.stack([sq, lab], axis=0)                      # (2, Npad)

    # Upper-triangular block enumeration (bj >= bi), split over 2 "cores".
    blk = [(i, j) for i in range(nb) for j in range(i, nb)]
    n_steps = len(blk)
    num_cores = 2 if n_steps >= 2 else 1
    spc = -(-n_steps // num_cores)               # steps per core
    pad_steps = num_cores * spc - n_steps
    table_padded = pad_steps > 0
    blk = blk + [(0, 0)] * pad_steps             # padded entries are skipped in-kernel
    bi_tab = jnp.asarray([p[0] for p in blk], dtype=jnp.int32)
    bj_tab = jnp.asarray([p[1] for p in blk], dtype=jnp.int32)

    # VMEM budgeting (residency decision + explicit vmem limit).
    itemsize = emb.dtype.itemsize
    try:
        vmem_cap = int(pltpu.get_tpu_info().vmem_capacity_bytes)
    except Exception:
        vmem_cap = 64 * 1024 * 1024              # conservative (v7x physical)

    def _est(resident):
        inter = 7 * tile * tile * 4                           # gram/d2/val/mask + acc
        side = n_pad * 512 + n_pad * 32                       # lane/sublane-padded sides
        if resident:
            return 2 * (n_pad * d * itemsize) + 2 * side + inter
        return 4 * tile * d * itemsize + 2 * (tile * 512 + tile * 32) + inter

    if vmem_resident is None:
        resident = _est(True) <= vmem_cap // 2
    else:
        resident = bool(vmem_resident)
    vmem_limit = int(min(int(vmem_cap * 0.9),
                         max(32 * 1024 * 1024, _est(resident) + 8 * 1024 * 1024)))

    n_pairs = n * (n - 1) // 2                   # static pair count -> constant reciprocal
    common = dict(margin=float(margin), tile=tile, n_valid=n, nb=nb, has_pad=has_pad,
                  inv_pairs=1.0 / float(n_pairs), spc=spc, n_steps=n_steps,
                  table_padded=table_padded)

    out_shape = jax.ShapeDtypeStruct((num_cores, 8, 128), jnp.float32)
    out_spec = pl.BlockSpec((1, 8, 128), lambda c, s, bi, bj: (c, 0, 0))
    scratch = [pltpu.VMEM((tile, tile), jnp.float32)]          # vector accumulator
    cparams = pltpu.CompilerParams(
        dimension_semantics=("parallel", "arbitrary"),
        vmem_limit_bytes=vmem_limit,
    )

    if resident:
        # Whole embedding matrix (and side arrays) VMEM-resident; rows are picked
        # in-kernel by block index -> each column block is loaded from HBM once.
        emb3 = emb.reshape(nb, tile, d)
        sidec3 = side_col.reshape(nb, tile, 2)
        sider3 = side_row.reshape(2, nb, tile).transpose(1, 0, 2)      # (nb, 2, tile)
        grid_spec = pltpu.PrefetchScalarGridSpec(
            num_scalar_prefetch=2,
            grid=(num_cores, spc),
            in_specs=[
                pl.BlockSpec((nb, tile, d), lambda c, s, bi, bj: (0, 0, 0)),
                pl.BlockSpec((nb, tile, 2), lambda c, s, bi, bj: (0, 0, 0)),
                pl.BlockSpec((nb, 2, tile), lambda c, s, bi, bj: (0, 0, 0)),
            ],
            out_specs=out_spec,
            scratch_shapes=scratch,
        )
        out = pl.pallas_call(
            functools.partial(_kernel_resident, **common),
            out_shape=out_shape, grid_spec=grid_spec, compiler_params=cparams,
        )(bi_tab, bj_tab, emb3, sidec3, sider3)
    else:
        # Tiled fallback: per-block DMAs driven by the scalar-prefetch block table.
        grid_spec = pltpu.PrefetchScalarGridSpec(
            num_scalar_prefetch=2,
            grid=(num_cores, spc),
            in_specs=[
                pl.BlockSpec((tile, d), lambda c, s, bi, bj: (bi[c * spc + s], 0)),
                pl.BlockSpec((tile, d), lambda c, s, bi, bj: (bj[c * spc + s], 0)),
                pl.BlockSpec((tile, 2), lambda c, s, bi, bj: (bi[c * spc + s], 0)),
                pl.BlockSpec((2, tile), lambda c, s, bi, bj: (0, bj[c * spc + s])),
            ],
            out_specs=out_spec,
            scratch_shapes=scratch,
        )
        out = pl.pallas_call(
            functools.partial(_kernel_tiled, **common),
            out_shape=out_shape, grid_spec=grid_spec, compiler_params=cparams,
        )(bi_tab, bj_tab, emb, emb, side_col, side_row)

    return jnp.sum(out[:, 0, 0])                 # sum of per-core partial means


def _reference_loss(emb, tgt, margin):
    """Pure-JAX reference mirroring the PyTorch forward with all-pairs selector."""
    emb = emb.astype(jnp.float32)
    diff = emb[:, None, :] - emb[None, :, :]
    d2 = jnp.sum(diff * diff, axis=-1)
    same = tgt[:, None] == tgt[None, :]
    n = emb.shape[0]
    iu = jnp.triu(jnp.ones((n, n), dtype=bool), k=1)
    pos_mask = same & iu
    neg_mask = (~same) & iu
    pos_sum = jnp.sum(jnp.where(pos_mask, d2, 0.0))
    neg_sum = jnp.sum(
        jnp.where(neg_mask, jnp.maximum(margin - jnp.sqrt(d2), 0.0) ** 2, 0.0)
    )
    cnt = jnp.sum(pos_mask) + jnp.sum(neg_mask)
    return (pos_sum + neg_sum) / cnt.astype(jnp.float32)


if __name__ == "__main__":
    key = jax.random.PRNGKey(0)
    k1, k2, k3, k4, k5, k6 = jax.random.split(key, 6)

    # Case 1: tiny batch, single block, single grid step (resident path).
    N1, D1 = 8, 32
    emb1 = jax.random.normal(k1, (N1, D1), dtype=jnp.float32)
    lab1 = jax.random.randint(k2, (N1,), 0, 3, dtype=jnp.int32)
    loss1 = jax.block_until_ready(online_contrastive_loss(emb1, lab1, margin=1.0))
    ref1 = _reference_loss(emb1, lab1, 1.0)
    assert jnp.allclose(loss1, ref1, atol=1e-4, rtol=1e-4), (loss1, ref1)

    # Case 2: multi-block upper-triangular grid with padding, bf16 embeddings
    # feeding the MXU, VMEM-resident embeddings, 2-way core split.
    N2, D2 = 300, 64
    emb2 = jax.random.normal(k3, (N2, D2), dtype=jnp.float32).astype(jnp.bfloat16)
    lab2 = jax.random.randint(k4, (N2,), 0, 5, dtype=jnp.int32)
    loss2 = jax.block_until_ready(online_contrastive_loss(emb2, lab2, margin=1.0))
    ref2 = _reference_loss(emb2, lab2, 1.0)
    assert jnp.allclose(loss2, ref2, atol=1e-3, rtol=1e-3), (loss2, ref2)

    # Case 3: force the tiled (non-resident, per-block DMA) fallback path, f32.
    N3, D3 = 260, 40
    emb3 = jax.random.normal(k5, (N3, D3), dtype=jnp.float32)
    lab3 = jax.random.randint(k6, (N3,), 0, 4, dtype=jnp.int32)
    loss3 = jax.block_until_ready(
        online_contrastive_loss(emb3, lab3, margin=1.0, vmem_resident=False))
    ref3 = _reference_loss(emb3, lab3, 1.0)
    assert jnp.allclose(loss3, ref3, atol=1e-3, rtol=1e-3), (loss3, ref3)

    print("KERNEL_OK")
</pallas_src>

<mosaic_0001>
module attributes {stable_mosaic.version = 11 : i64} {
  func.func @_kernel_resident(%arg0: i32, %arg1: i32, %arg2: memref<1xi32, #tpu.memory_space<smem>>, %arg3: memref<1xi32, #tpu.memory_space<smem>>, %arg4: memref<1x8x32xf32, #tpu.memory_space<vmem>>, %arg5: memref<1x8x2xf32, #tpu.memory_space<vmem>>, %arg6: memref<1x2x8xf32, #tpu.memory_space<vmem>>, %arg7: memref<1x8x128xf32, #tpu.memory_space<vmem>>, %arg8: memref<8x8xf32, #tpu.memory_space<vmem>>) attributes {dimension_semantics = [#tpu.dimension_semantics<parallel>, #tpu.dimension_semantics<arbitrary>], iteration_bounds = array<i64: 1, 1>, scalar_prefetch = 2 : i64, scratch_operands = 1 : i64, tpu.core_type = #tpu.core_type<tc>, window_params = [{pipeline_mode = #tpu.pipeline_mode<synchronous>, transform_indices = @transform_0, window_bounds = array<i64: 1, 8, 32>}, {pipeline_mode = #tpu.pipeline_mode<synchronous>, transform_indices = @transform_1, window_bounds = array<i64: 1, 8, 2>}, {pipeline_mode = #tpu.pipeline_mode<synchronous>, transform_indices = @transform_2, window_bounds = array<i64: 1, 2, 8>}, {transform_indices = @transform_3, window_bounds = array<i64: 1, 8, 128>}]} {
    %c1_i32 = arith.constant 1 : i32
    %0 = arith.muli %arg0, %c1_i32 : i32
    %1 = arith.addi %0, %arg1 : i32
    %c0_i32 = arith.constant 0 : i32
    %2 = arith.cmpi eq, %arg1, %c0_i32 : i32
    %3 = arith.extui %2 : i1 to i32
    %c0_i32_0 = arith.constant 0 : i32
    %4 = arith.cmpi ne, %3, %c0_i32_0 : i32
    scf.if %4 {
      %cst_16 = arith.constant 0.000000e+00 : f32
      %53 = vector.broadcast %cst_16 : f32 to vector<8x8xf32>
      %c0_17 = arith.constant 0 : index
      %c0_18 = arith.constant 0 : index
      %54 = vector.load %arg8[%c0_17, %c0_18] : memref<8x8xf32, #tpu.memory_space<vmem>>, vector<8x8xf32>
      tpu.vector_store %arg8[%c0_17, %c0_18], %53 {strides = array<i32>} : memref<8x8xf32, #tpu.memory_space<vmem>>, vector<8x8xf32>,
    } else {
    }
    %5 = arith.index_cast %1 : i32 to index
    %6 = memref.load %arg2[%5] : memref<1xi32, #tpu.memory_space<smem>>
    %7 = arith.index_cast %1 : i32 to index
    %8 = memref.load %arg3[%7] : memref<1xi32, #tpu.memory_space<smem>>
    %9 = arith.index_cast %6 : i32 to index
    %c0 = arith.constant 0 : index
    %c0_1 = arith.constant 0 : index
    %10 = vector.load %arg4[%9, %c0, %c0_1] : memref<1x8x32xf32, #tpu.memory_space<vmem>>, vector<1x8x32xf32>
    %11 = vector.shape_cast %10 : vector<1x8x32xf32> to vector<8x32xf32>
    %12 = arith.index_cast %8 : i32 to index
    %c0_2 = arith.constant 0 : index
    %c0_3 = arith.constant 0 : index
    %13 = vector.load %arg4[%12, %c0_2, %c0_3] : memref<1x8x32xf32, #tpu.memory_space<vmem>>, vector<1x8x32xf32>
    %14 = vector.shape_cast %13 : vector<1x8x32xf32> to vector<8x32xf32>
    %15 = arith.index_cast %6 : i32 to index
    %c0_4 = arith.constant 0 : index
    %c0_5 = arith.constant 0 : index
    %16 = vector.load %arg5[%15, %c0_4, %c0_5] : memref<1x8x2xf32, #tpu.memory_space<vmem>>, vector<1x8x2xf32>
    %17 = vector.shape_cast %16 : vector<1x8x2xf32> to vector<8x2xf32>
    %18 = arith.index_cast %8 : i32 to index
    %c0_6 = arith.constant 0 : index
    %c0_7 = arith.constant 0 : index
    %19 = vector.load %arg6[%18, %c0_6, %c0_7] : memref<1x2x8xf32, #tpu.memory_space<vmem>>, vector<1x2x8xf32>
    %20 = vector.shape_cast %19 : vector<1x2x8xf32> to vector<2x8xf32>
    %21 = vector.extract_strided_slice %17 {offsets = [0, 0], sizes = [8, 1], strides = [1, 1]} : vector<8x2xf32> to vector<8x1xf32>
    %22 = vector.extract_strided_slice %20 {offsets = [0, 0], sizes = [1, 8], strides = [1, 1]} : vector<2x8xf32> to vector<1x8xf32>
    %23 = vector.extract_strided_slice %17 {offsets = [0, 1], sizes = [8, 1], strides = [1, 1]} : vector<8x2xf32> to vector<8x1xf32>
    %24 = vector.extract_strided_slice %20 {offsets = [1, 0], sizes = [1, 8], strides = [1, 1]} : vector<2x8xf32> to vector<1x8xf32>
    %cst = arith.constant dense<0.000000e+00> : vector<8x8xf32>
    %25 = tpu.matmul %11, %14, %cst {dimension_numbers = #tpu.dot_dimension_numbers<[1], [1], [0], [0], [0, 0, 1, 0], [], []>} : vector<8x32xf32>, vector<8x32xf32>, vector<8x8xf32> -> vector<8x8xf32>
    %26 = vector.broadcast %21 : vector<8x1xf32> to vector<8x8xf32>
    %27 = vector.broadcast %22 : vector<1x8xf32> to vector<8x8xf32>
    %28 = arith.addf %26, %27 : vector<8x8xf32>
    %cst_8 = arith.constant 2.000000e+00 : f32
    %29 = vector.broadcast %cst_8 : f32 to vector<8x8xf32>
    %30 = arith.mulf %29, %25 : vector<8x8xf32>
    %31 = arith.subf %28, %30 : vector<8x8xf32>
    %cst_9 = arith.constant 0.000000e+00 : f32
    %32 = vector.broadcast %cst_9 : f32 to vector<8x8xf32>
    %33 = arith.maximumf %31, %32 : vector<8x8xf32>
    %34 = math.sqrt %33 : vector<8x8xf32>
    %cst_10 = arith.constant 1.000000e+00 : f32
    %35 = vector.broadcast %cst_10 : f32 to vector<8x8xf32>
    %36 = arith.subf %35, %34 : vector<8x8xf32>
    %cst_11 = arith.constant 0.000000e+00 : f32
    %37 = vector.broadcast %cst_11 : f32 to vector<8x8xf32>
    %38 = arith.maximumf %36, %37 : vector<8x8xf32>
    %39 = vector.broadcast %23 : vector<8x1xf32> to vector<8x8xf32>
    %40 = vector.broadcast %24 : vector<1x8xf32> to vector<8x8xf32>
    %41 = arith.cmpf oeq, %39, %40 : vector<8x8xf32>
    %42 = arith.mulf %38, %38 : vector<8x8xf32>
    %43 = arith.select %41, %33, %42 : vector<8x8xi1>, vector<8x8xf32>
    %44 = arith.cmpi sgt, %8, %6 : i32
    %45 = arith.extui %44 : i1 to i32
    %c0_i32_12 = arith.constant 0 : i32
    %46 = arith.cmpi ne, %45, %c0_i32_12 : i32
    scf.if %46 {
      %c0_16 = arith.constant 0 : index
      %c0_17 = arith.constant 0 : index
      %53 = vector.load %arg8[%c0_16, %c0_17] : memref<8x8xf32, #tpu.memory_space<vmem>>, vector<8x8xf32>
      %54 = arith.addf %53, %43 : vector<8x8xf32>
      %c0_18 = arith.constant 0 : index
      %c0_19 = arith.constant 0 : index
      %55 = vector.load %arg8[%c0_18, %c0_19] : memref<8x8xf32, #tpu.memory_space<vmem>>, vector<8x8xf32>
      tpu.vector_store %arg8[%c0_18, %c0_19], %54 {strides = array<i32>} : memref<8x8xf32, #tpu.memory_space<vmem>>, vector<8x8xf32>,
    } else {
    }
    %true = arith.constant true
    %47 = arith.xori %44, %true : i1
    %48 = arith.extui %47 : i1 to i32
    %c0_i32_13 = arith.constant 0 : i32
    %49 = arith.cmpi ne, %48, %c0_i32_13 : i32
    scf.if %49 {
      %53 = tpu.iota {dimensions = array<i32: 0>} : vector<8x1xi32>
      %c8_i32 = arith.constant 8 : i32
      %54 = arith.muli %6, %c8_i32 : i32
      %55 = vector.broadcast %54 : i32 to vector<8x1xi32>
      %56 = arith.addi %53, %55 : vector<8x1xi32>
      %57 = tpu.iota {dimensions = array<i32: 1>} : vector<1x8xi32>
      %c8_i32_16 = arith.constant 8 : i32
      %58 = arith.muli %8, %c8_i32_16 : i32
      %59 = vector.broadcast %58 : i32 to vector<1x8xi32>
      %60 = arith.addi %57, %59 : vector<1x8xi32>
      %61 = vector.broadcast %60 : vector<1x8xi32> to vector<8x8xi32>
      %62 = vector.broadcast %56 : vector<8x1xi32> to vector<8x8xi32>
      %63 = arith.cmpi sgt, %61, %62 : vector<8x8xi32>
      %c0_17 = arith.constant 0 : index
      %c0_18 = arith.constant 0 : index
      %64 = vector.load %arg8[%c0_17, %c0_18] : memref<8x8xf32, #tpu.memory_space<vmem>>, vector<8x8xf32>
      %cst_19 = arith.constant 0.000000e+00 : f32
      %65 = vector.broadcast %cst_19 : f32 to vector<8x8xf32>
      %66 = arith.select %63, %43, %65 : vector<8x8xi1>, vector<8x8xf32>
      %67 = arith.addf %64, %66 : vector<8x8xf32>
      %c0_20 = arith.constant 0 : index
      %c0_21 = arith.constant 0 : index
      %68 = vector.load %arg8[%c0_20, %c0_21] : memref<8x8xf32, #tpu.memory_space<vmem>>, vector<8x8xf32>
      tpu.vector_store %arg8[%c0_20, %c0_21], %67 {strides = array<i32>} : memref<8x8xf32, #tpu.memory_space<vmem>>, vector<8x8xf32>,
    } else {
    }
    %c0_i32_14 = arith.constant 0 : i32
    %50 = arith.cmpi eq, %arg1, %c0_i32_14 : i32
    %51 = arith.extui %50 : i1 to i32
    %c0_i32_15 = arith.constant 0 : i32
    %52 = arith.cmpi ne, %51, %c0_i32_15 : i32
    scf.if %52 {
      %c0_16 = arith.constant 0 : index
      %c0_17 = arith.constant 0 : index
      %53 = vector.load %arg8[%c0_16, %c0_17] : memref<8x8xf32, #tpu.memory_space<vmem>>, vector<8x8xf32>
      %54 = vector.shape_cast %53 : vector<8x8xf32> to vector<1x8x8xf32>
      %cst_18 = arith.constant dense<0.000000e+00> : vector<1xf32>
      %55 = vector.multi_reduction <add>, %54, %cst_18 [1, 2] : vector<1x8x8xf32> to vector<1xf32>
      %56 = vector.shape_cast %55 : vector<1xf32> to vector<1x1x1xf32>
      %57 = vector.extract %56[0, 0, 0] : f32 from vector<1x1x1xf32>
      %cst_19 = arith.constant 0.0357142873 : f32
      %58 = arith.mulf %57, %cst_19 : f32
      %cst_20 = arith.constant 0.000000e+00 : f32
      %59 = vector.broadcast %cst_20 : f32 to vector<1x8x128xf32>
      %60 = vector.broadcast %58 : f32 to vector<1x8x128xf32>
      %61 = arith.addf %59, %60 : vector<1x8x128xf32>
      %c0_21 = arith.constant 0 : index
      %c0_22 = arith.constant 0 : index
      %c0_23 = arith.constant 0 : index
      %62 = vector.load %arg7[%c0_21, %c0_22, %c0_23] : memref<1x8x128xf32, #tpu.memory_space<vmem>>, vector<1x8x128xf32>
      tpu.vector_store %arg7[%c0_21, %c0_22, %c0_23], %61 {strides = array<i32>} : memref<1x8x128xf32, #tpu.memory_space<vmem>>, vector<1x8x128xf32>,
    } else {
    }
    return
  }
  func.func @transform_0(%arg0: i32, %arg1: i32, %arg2: memref<1xi32, #tpu.memory_space<smem>>, %arg3: memref<1xi32, #tpu.memory_space<smem>>) -> (i32, i32, i32) {
    %c0_i32 = arith.constant 0 : i32
    %c0_i32_0 = arith.constant 0 : i32
    %c0_i32_1 = arith.constant 0 : i32
    %c0_i32_2 = arith.constant 0 : i32
    return %c0_i32, %c0_i32_0, %c0_i32_1 : i32, i32, i32
  }
  func.func @transform_1(%arg0: i32, %arg1: i32, %arg2: memref<1xi32, #tpu.memory_space<smem>>, %arg3: memref<1xi32, #tpu.memory_space<smem>>) -> (i32, i32, i32) {
    %c0_i32 = arith.constant 0 : i32
    %c0_i32_0 = arith.constant 0 : i32
    %c0_i32_1 = arith.constant 0 : i32
    %c0_i32_2 = arith.constant 0 : i32
    return %c0_i32, %c0_i32_0, %c0_i32_1 : i32, i32, i32
  }
  func.func @transform_2(%arg0: i32, %arg1: i32, %arg2: memref<1xi32, #tpu.memory_space<smem>>, %arg3: memref<1xi32, #tpu.memory_space<smem>>) -> (i32, i32, i32) {
    %c0_i32 = arith.constant 0 : i32
    %c0_i32_0 = arith.constant 0 : i32
    %c0_i32_1 = arith.constant 0 : i32
    %c0_i32_2 = arith.constant 0 : i32
    return %c0_i32, %c0_i32_0, %c0_i32_1 : i32, i32, i32
  }
  func.func @transform_3(%arg0: i32, %arg1: i32, %arg2: memref<1xi32, #tpu.memory_space<smem>>, %arg3: memref<1xi32, #tpu.memory_space<smem>>) -> (i32, i32, i32) {
    %c0_i32 = arith.constant 0 : i32
    %c0_i32_0 = arith.constant 0 : i32
    %c0_i32_1 = arith.constant 0 : i32
    return %arg0, %c0_i32, %c0_i32_0 : i32, i32, i32
  }
}

</mosaic_0001>

<bundles_post_ra>
// kernel: tpu_custom_call.1
= control target key start
LH: loop header
LB: loop body
LE: loop exit
PB: predicated region body
PF: predicated region fallthrough
CT: control target
= control target key end

     0   :  { %12 = vsyncpa [#allocation7], 0  ;;  %vm24_vm0 = vcmask 64512   ;;  %vm39_vm1 = vcmask 261120   ;;  %v265_v0 = vmov 0.0   ;;  %vm266_vm2 = vmmov 0   ;;  %s364_s0 = inlined_call_operand.<no memory space> [shape: s32[1], index: 0, kind: input, shape index: {}]   ;;  %s365_s1 = inlined_call_operand.<no memory space> [shape: s32[1], index: 1, kind: input, shape index: {}]   ;;  %s366_s2 = inlined_call_operand.vmem [shape: f32[1,8,32], index: 2, kind: input, shape index: {}]   ;;  %s367_s3 = inlined_call_operand.vmem [shape: f32[1,8,2], index: 3, kind: input, shape index: {}]   ;;  %s368_s4 = inlined_call_operand.vmem [shape: f32[1,2,8], index: 4, kind: input, shape index: {}]   ;;  %s369_s5 = inlined_call_operand.hbm [shape: f32[1,8,128], index: 5, kind: output, shape index: {}]  }
   0x1   :  { %s217_s20 = sshll.u32 %s365_s1, 3  ;;  %25 = vst.msk [vmem:[#allocation2] sm:$0xff] %vm24_vm0, %v265_v0  ;;  %225 = vmatprep.subr.mxu0 %v265_v0  ;;  %s314_s28 = sshll.u32 %s364_s0, 3  ;;  %227 = vmatprep.mubr.msk.f32.mxu0 %vm266_vm2, %v265_v0  ;;  %v267_v2 = vmov 0   ;;  %v268_v5 = vmov 1   ;;  %v121_v6 = vlaneseq }
   0x2   :  { %s32_s25 = scalar_lea.vmem %s366_s2, %s217_s20  ;;  %s29_s6 = scalar_lea.vmem %s366_s2, %s314_s28  ;;  %237 = vset.pattern.permute.xlu0 %v267_v2 }
   0x3   :  { %v33_v1 = vld [vmem:[%s32_s25] sm:$0xff]  ;;  %s34_s9 = scalar_lea.vmem %s367_s3, %s314_s28  ;;  %s218_s2 = sshll.u32 %s365_s1, 1  ;;  %v122_v7 = vshrl.u32 %v121_v6, 7 }
   0x4   :  { %226 = vmatpush3.xpose.msk.msra.mxu0 %vm39_vm1, %v33_v1  ;;  %v30_v3 = vld [vmem:[%s29_s6] sm:$0xff]  ;;  %s37_s3 = scalar_lea.vmem %s368_s4, %s218_s2  ;;  %p221_p0 = scmp.le.s32.totalorder %s365_s1, %s364_s0 }
   0x5   :  { %v35_v4 = vld [vmem:[%s34_s9] sm:$0xff]  ;;  %v123_v8 = vsub.s32 0, %v122_v7  ;;  %v144_v19 = vsub.s32 1, %v122_v7 }
   0x6   :  { %118 = vperm.xlu0 %237, %v35_v4   ;;  %v38_v9 = vld [vmem:[%s37_s3] sm:$0x3] }
   0x7   :  { %228 = vmatmul.mubr.msk.f32.vlgmr.msra.gmra.mrb[0].mxu0 %vm39_vm1, %v30_v3  ;;  %v124_v10 = vrot.slane %v38_v9, %v123_v8  ;;  %v145_v23 = vrot.slane %v38_v9, %v144_v19 }
   0x8   :  { %v153_v30 = vld [vmem:[#allocation2] sm:$0xff] (!%p221_p0) }
   0xa   :  { %238 = vset.pattern.permute.xlu0 %v268_v5 }
   0xb   :  { %139 = vperm.xlu0 %238, %v35_v4  }
  0x85   :  { %v119_v11 = vpop.permute.xlu0 %118 }
  0x86   :  { %v125_v12 = vadd.f32 %v124_v10, %v119_v11 }
  0x8a   :  { %v140_v25 = vpop.permute.xlu0 %139 }
  0x8b   :  { %vm146_vm5 = vcmp.eq.f32.partialorder %v140_v25, %v145_v23 }
  0xda   :  { %v112_v13 = vpop.f32.mrb[0].mxu0 }
  0xdb   :  { %v126_v14 = vmul.f32 2.0, %v112_v13  ;;  %v229_v15 = vpop.f32.mrb[1].mxu0 }
  0xdd   :  { %v127_v16 = vsub.f32 %v125_v12, %v126_v14 }
  0xdf   :  { %v128_v17 = vmax.f32 %v127_v16, 0.0 }
  0xe1   :  { %239 = vrsqrt.f32 %v128_v17  ;;  %vm131_vm3 = vcmp.eq.f32.partialorder %v128_v17, inf  ;;  %v134_v21 = vand.u32 2147483648, %v128_v17  ;;  %vm133_vm4 = vcmp.eq.f32.partialorder %v128_v17, 0.0 }
  0xeb   :  { %v240_v18 = vpop.eup %239 }
  0xec   :  { %v130_v20 = vmul.f32 %v240_v18, %v128_v17 }
  0xee   :  { %v132_v22 = vsel %vm131_vm3, %v128_v17, %v130_v20 }
  0xef   :  { %v135_v24 = vsel %vm133_vm4, %v134_v21, %v132_v22 }
  0xf0   :  { %v136_v26 = vsub.f32 1.0, %v135_v24  ;;  %152 = sbr.rel (%p221_p0) target bundleno = 250 (0xfa), region = 21 }
  0xf2   :  { %v137_v27 = vmax.f32 %v136_v26, 0.0 }
  0xf4   :  { %v147_v28 = vmul.f32 %v137_v27, %v137_v27 }
  0xf6   :  { %v148_v29 = vsel %vm146_vm5, %v128_v17, %v147_v28 }
  0xf7   :  { %v154_v31 = vadd.f32 %v153_v30, %v148_v29 }
  0xf9   :  { %156 = vst.msk [vmem:[#allocation2] sm:$0xff] %vm24_vm0, %v154_v31 }
  0xfa PF:  { %p222_p1 = scmp.gt.s32.totalorder %s365_s1, %s364_s0 }
  0xfb   :  { %v163_v32 = vstv (!%p222_p1), %s314_s28  ;;  %v166_v33 = vand.u32 (!%p222_p1), 127, %v121_v6  ;;  %v167_v34 = vstv (!%p222_p1), %s217_s20 }
  0xfc   :  { %160 = sbr.rel (%p222_p1) target bundleno = 260 (0x104), region = 25  ;;  %v164_v35 = vadd.s32 (!%p222_p1), %v163_v32, %v122_v7 }
  0xfd   :  { %v168_v36 = vadd.s32 (!%p222_p1), %v167_v34, %v166_v33 }
  0xff   :  { %vm169_vm6 = vcmp.gt.s32.totalorder (!%p222_p1), %v168_v36, %v164_v35 }
 0x100   :  { %v170_v37 = vld [vmem:[#allocation2] sm:$0xff] (!%p222_p1)  ;;  %v171_v38 = vsel (!%p222_p1), %vm169_vm6, %v148_v29, 0.0 }
 0x101   :  { %v172_v39 = vadd.f32 (!%p222_p1), %v171_v38, %v170_v37 }
 0x103   :  { %174 = vst.msk [vmem:[#allocation2] sm:$0xff] %vm24_vm0, %v172_v39 }
 0x104 PF:  { %s269_s0 = smov [#allocation6]  }
 0x105   :  { %s200_s1 = sshll.u32 %s269_s0, 4  ;;  %s201_s1 = int_to_ptr.vmem [resolvable:$true] %s200_s1 }
 0x106   :  { %s241_s25 = scalar_lea.vmem %s201_s1, 128  ;;  %p246_p3 = scmp.lt.s32.totalorder %s201_s1, %s201_s1 }
 0x107   :  { %p242_p2 = scmp.ne.s32.totalorder %s201_s1, %s241_s25  ;;  %p247_p4 = scmp.lt.s32.totalorder %s241_s25, %s241_s25 }
 0x109   :  { %p248_p5 = por %p247_p4, %p246_p3 }
 0x10a   :  { %v178_v40 = vld [vmem:[#allocation2] sm:$0xff] }
 0x10b   :  { %v180_v41 = vsel %vm24_vm0, %v178_v40, 0.0  ;;  %p249_p6 = pnand %p248_p5, %p242_p2 }
 0x10c   :  { %181 = vadd.xlane.f32.xlu0 %v180_v41 }
 0x199   :  { %v182_v42 = vpop.xlane.xlu0 %181 }
 0x19a   :  { %v183_v43 = vrot.slane %v182_v42, 4 }
 0x19c   :  { %v184_v44 = vadd.f32 %v183_v43, %v182_v42 }
 0x19e   :  { %v185_v45 = vrot.slane %v184_v44, 2 }
 0x1a0   :  { %v186_v46 = vadd.f32 %v185_v45, %v184_v44 }
 0x1a2   :  { %v187_v47 = vrot.slane %v186_v46, 1 }
 0x1a4   :  { %v188_v48 = vadd.f32 %v187_v47, %v186_v46 }
 0x1a6   :  { %230 = vpush %v188_v48 }
 0x1d7   :  { %s231_s20 = spop %230 }
 0x1d8   :  { %s190_s24 = smul.f32 0.035714287, %s231_s20 }
 0x1da   :  { %v191_v49 = vstv %s190_s24 }
 0x1db   :  { %193 = vst [vmem:[#allocation6] sm:$0xff] %v191_v49 }
 0x1dc   :  { %252 = shalt.err (!%p249_p6)
}
 0x1dd   :  { %s253_s28 = scalar_lea.hbm %s369_s5, 128 }
 0x1de   :  { %p254_p7 = scmp.ne.s32.totalorder %s369_s5, %s253_s28  ;;  %p257_p8 = scmp.lt.u32.totalorder %s253_s28, %s369_s5 }
 0x1e0   :  { %p259_p9 = pnand %p257_p8, %p254_p7 }
 0x1e2   :  { %262 = shalt.err (!%p259_p9)
}
 0x1e3   :  { %203 = dma.vmem_to_hbm [thread:$0]  %s201_s1, 128, %s369_s5, [#allocation7]  }
 0x1e4   :  { %263 = dma.done.wait [#allocation7], 128  }
 0x1e5   :  { %264 = vsyncadd [#allocation7], 4294967168 }
 0x1e6   :  { %207 = vsyncpa [#allocation7], 1 }

</bundles_post_ra>
